<compile_context>
chip_gen: v7x
topology: tpu7x:2x2x1
jax: 0.10.0
libtpu: 0.0.40
codegen_flags: <defaults>
</compile_context>

<pallas_src>
import math
import numpy as np
import jax
import jax.numpy as jnp
from jax import lax
from jax.experimental import pallas as pl
from jax.experimental.pallas import tpu as pltpu


_MXU_DTYPE = jnp.bfloat16      # matmul operand dtype (f32 accumulation)
_BN_EPS = 1e-5


def _vmem_limit(est_bytes):
    return int(min(max(2 * est_bytes, 32 * 1024 * 1024), 64 * 1024 * 1024))


# ---------------- in-kernel building blocks ----------------

def _mm(a, b):
    """MXU matmul with bf16 operands and f32 accumulation."""
    return jnp.dot(a.astype(_MXU_DTYPE), b.astype(_MXU_DTYPE),
                   preferred_element_type=jnp.float32)


def _bn_train(h, gamma, beta, rmask_f, inv_cnt):
    """Training-mode BatchNorm1d with masked (valid-row-only) batch statistics."""
    hm = h * rmask_f
    mean = jnp.sum(hm, axis=0, keepdims=True) * inv_cnt
    d = (h - mean) * rmask_f
    var = jnp.sum(d * d, axis=0, keepdims=True) * inv_cnt
    return (h - mean) * lax.rsqrt(var + _BN_EPS) * gamma + beta


def _small_linear(parts, w, b):
    """y = concat(parts, -1) @ w + b without materializing the concat.

    For tiny K (coordinate inputs, K=3/6) this is a chain of VPU broadcast
    FMAs instead of a nearly-empty MXU pass."""
    k_total = sum(p.shape[1] for p in parts)
    off = 0
    acc = None
    for p in parts:
        kp = p.shape[1]
        if k_total <= 8:
            for t in range(kp):
                term = p[:, t:t + 1] * w[off + t:off + t + 1, :]
                acc = term if acc is None else acc + term
        else:
            term = _mm(p, w[off:off + kp, :])
            acc = term if acc is None else acc + term
        off += kp
    return acc + b


def _project_coords(p, coord_parts, rmask_f, inv_cnt):
    """project_input: Linear -> BN -> Linear -> BN -> ReLU on coordinates."""
    c = _small_linear(coord_parts, p['proj0_w'][...], p['proj0_b'][...])
    c = _bn_train(c, p['proj0_g'][...], p['proj0_be'][...], rmask_f, inv_cnt)
    c = _mm(c, p['proj1_w'][...]) + p['proj1_b'][...]
    c = _bn_train(c, p['proj1_g'][...], p['proj1_be'][...], rmask_f, inv_cnt)
    return jnp.maximum(c, 0.0)


def _mlp_apply(p, x, coord_parts, rmask_f, inv_cnt):
    """Whole MLP (project_input + layers + out) on VMEM-resident values."""
    c = _project_coords(p, coord_parts, rmask_f, inv_cnt)
    h = x
    n_layers = len(p['layers'])
    for i, lp in enumerate(p['layers']):
        w = lp['w'][...]
        if i == n_layers // 2:
            # torch.cat([x, coords], dim=1) folded into a split-weight matmul
            hw = h.shape[1]
            h = _mm(h, w[:hw, :]) + _mm(c, w[hw:, :]) + lp['b'][...]
        else:
            h = _mm(h, w) + lp['b'][...]
        h = _bn_train(h, lp['g'][...], lp['be'][...], rmask_f, inv_cnt)
        h = jnp.maximum(h, 0.0)
    return _mm(h, p['out_w'][...]) + p['out_b'][...]


# ---------------- fused relate-MLP kernel ----------------

def _make_relate_kernel(treedef, n_leaves, n_pad):
    def kernel(nv_ref, x_ref, c_ref, *rest):
        w_refs = rest[:n_leaves]
        o_ref = rest[n_leaves]
        b = pl.program_id(0)
        p = jax.tree_util.tree_unflatten(treedef, list(w_refs))
        n_valid = nv_ref[b]
        ridx = lax.broadcasted_iota(jnp.int32, (n_pad, 1), 0)
        rmask_f = (ridx < n_valid).astype(jnp.float32)
        inv_cnt = 1.0 / jnp.maximum(n_valid, 1).astype(jnp.float32)
        logit = _mlp_apply(p, x_ref[0], [c_ref[0]], rmask_f, inv_cnt)
        o_ref[0] = logit.astype(o_ref.dtype)
    return kernel


def relate_mlp_pallas(params, x_pad, coords_pad, ncounts):
    bs, n_pad, feat = x_pad.shape
    leaves, treedef = jax.tree_util.tree_flatten(params)
    kernel = _make_relate_kernel(treedef, len(leaves), n_pad)
    wspecs = [pl.BlockSpec(l.shape, lambda b, *_: (0, 0)) for l in leaves]
    grid_spec = pltpu.PrefetchScalarGridSpec(
        num_scalar_prefetch=1,
        grid=(bs,),
        in_specs=[pl.BlockSpec((1, n_pad, feat), lambda b, *_: (b, 0, 0)),
                  pl.BlockSpec((1, n_pad, 3), lambda b, *_: (b, 0, 0))] + wspecs,
        out_specs=pl.BlockSpec((1, n_pad, 1), lambda b, *_: (b, 0, 0)),
    )
    hid = params['layers'][0]['w'].shape[1]
    w_bytes = sum(int(np.prod(l.shape)) * 4 for l in leaves)
    est = w_bytes * 2 + n_pad * hid * 4 * 10 + n_pad * feat * 4 * 4
    out = pl.pallas_call(
        kernel,
        out_shape=jax.ShapeDtypeStruct((bs, n_pad, 1), jnp.float32),
        grid_spec=grid_spec,
        compiler_params=pltpu.CompilerParams(
            dimension_semantics=("parallel",),
            vmem_limit_bytes=_vmem_limit(est)),
    )(ncounts, x_pad, coords_pad, *leaves)
    return out


# ---------------- fused pairwise-P-MLP + context kernel ----------------

def _make_p_kernel(treedef, n_leaves, n_pad, k_pad, n_rel, feat):
    m_pad = n_pad * k_pad

    def kernel(nv_ref, kv_ref, x_ref, c_ref, tf_ref, tc_ref, rk_ref, *rest):
        w_refs = rest[:n_leaves]
        plog_ref = rest[n_leaves]
        ctx_ref = rest[n_leaves + 1]
        b = pl.program_id(0)
        p = jax.tree_util.tree_unflatten(treedef, list(w_refs))
        n_valid = nv_ref[b]
        k_valid = kv_ref[b]

        xi = x_ref[0]        # (n_pad, feat)
        coords = c_ref[0]    # (n_pad, 3)
        tkf = tf_ref[0]      # (k_pad, feat)
        tkc = tc_ref[0]      # (k_pad, 3)
        rk = rk_ref[0]       # (k_pad, 1)

        # ---- validity masks (voxel rows and pairwise rows; row = n*k_pad + j) ----
        nidx = lax.broadcasted_iota(jnp.int32, (n_pad, 1), 0)
        rmask_n = (nidx < n_valid).astype(jnp.float32)
        inv_n = 1.0 / jnp.maximum(n_valid, 1).astype(jnp.float32)

        ridx = lax.broadcasted_iota(jnp.int32, (m_pad, 1), 0)
        rmask_m = jnp.logical_and(ridx // k_pad < n_valid,
                                  ridx % k_pad < k_valid).astype(jnp.float32)
        inv_m = 1.0 / jnp.maximum(n_valid * k_valid, 1).astype(jnp.float32)

        # ---- 0/1 selection matrices for repeat / tile expansion (iota, MXU) ----
        rowm = lax.broadcasted_iota(jnp.int32, (m_pad, n_pad), 0)
        colm = lax.broadcasted_iota(jnp.int32, (m_pad, n_pad), 1)
        R = (rowm // k_pad == colm).astype(jnp.float32)            # repeat N rows k times
        rowk = lax.broadcasted_iota(jnp.int32, (m_pad, k_pad), 0)
        colk = lax.broadcasted_iota(jnp.int32, (m_pad, k_pad), 1)
        T = (rowk % k_pad == colk).astype(jnp.float32)             # tile top-k rows N times

        # ---- coordinate branch: project_input(cat([coord_repeat, rel_coord])) ----
        # relative coords differ per pair, so this runs at (N*k) rows.
        crd_rep = jnp.dot(R, coords, preferred_element_type=jnp.float32)
        crd_til = jnp.dot(T, tkc, preferred_element_type=jnp.float32)
        rel_crd = crd_til - crd_rep
        c_proj = _project_coords(p, [crd_rep, rel_crd], rmask_m, inv_m)   # (m_pad, dim_project)

        # ---- pre-mid MLP layers at N rows (pairwise-invariance hoisting) ----
        # Rows of the pairwise input are exact k-fold repeats of the N voxel
        # rows, and BN statistics over k-fold repeated rows equal the stats
        # over the N rows, so these layers are computed once per voxel.
        layers = p['layers']
        n_layers = len(layers)
        mid = n_layers // 2
        h = xi
        for i in range(mid):
            lp = layers[i]
            h = _mm(h, lp['w'][...]) + lp['b'][...]
            h = _bn_train(h, lp['g'][...], lp['be'][...], rmask_n, inv_n)
            h = jnp.maximum(h, 0.0)

        # ---- mid layer: split-weight matmul.  The x-half is computed at N
        # rows and only its *result* is repeated to N*k rows. ----
        lmid = layers[mid]
        wmid = lmid['w'][...]
        hwid = h.shape[1]
        hx = _mm(h, wmid[:hwid, :])                                     # (n_pad, feature)
        h = (jnp.dot(R, hx, preferred_element_type=jnp.float32)
             + _mm(c_proj, wmid[hwid:, :]) + lmid['b'][...])            # (m_pad, feature)
        h = _bn_train(h, lmid['g'][...], lmid['be'][...], rmask_m, inv_m)
        h = jnp.maximum(h, 0.0)

        # ---- post-mid layers + out at (N*k) rows ----
        for i in range(mid + 1, n_layers):
            lp = layers[i]
            h = _mm(h, lp['w'][...]) + lp['b'][...]
            h = _bn_train(h, lp['g'][...], lp['be'][...], rmask_m, inv_m)
            h = jnp.maximum(h, 0.0)
        logit = _mm(h, p['out_w'][...]) + p['out_b'][...]               # (m_pad, n_rel)
        plog_ref[0] = logit.astype(plog_ref.dtype)

        # ---- fused context epilogue: softmax over relations, weight by
        # relate_prob[topk], aggregate over k, normalize. ----
        mx = jnp.max(logit, axis=-1, keepdims=True)
        e = jnp.exp(logit - mx)
        P = e * pl.reciprocal(jnp.sum(e, axis=-1, keepdims=True), approx=True)
        rk_col = jnp.dot(T, rk, preferred_element_type=jnp.float32)      # (m_pad, 1)
        Pw = P * rk_col
        tkf_rep = jnp.dot(T, tkf, preferred_element_type=jnp.float32)    # (m_pad, feat)

        rown = lax.broadcasted_iota(jnp.int32, (n_pad, m_pad), 0)
        colnm = lax.broadcasted_iota(jnp.int32, (n_pad, m_pad), 1)
        G = (colnm // k_pad == rown).astype(jnp.float32)                 # group-sum over k

        # all relation denominators in one matmul
        den = jnp.dot(G, Pw, preferred_element_type=jnp.float32)         # (n_pad, n_rel)
        inv_den = pl.reciprocal(den, approx=True)
        for r in range(n_rel):
            w_col = Pw[:, r:r + 1]                                       # (m_pad, 1)
            num_r = jnp.dot(G, w_col * tkf_rep, preferred_element_type=jnp.float32)
            ctx_ref[0, :, r * feat:(r + 1) * feat] = (
                num_r * inv_den[:, r:r + 1]).astype(ctx_ref.dtype)

    return kernel


def p_mlp_context_pallas(params, x_pad, coords_pad, topk_feat, topk_coord,
                         relate_k, ncounts, kcounts):
    bs, n_pad, feat = x_pad.shape
    k_pad = topk_feat.shape[1]
    n_rel = params['out_w'].shape[1]
    m_pad = n_pad * k_pad
    leaves, treedef = jax.tree_util.tree_flatten(params)
    kernel = _make_p_kernel(treedef, len(leaves), n_pad, k_pad, n_rel, feat)
    wspecs = [pl.BlockSpec(l.shape, lambda b, *_: (0, 0)) for l in leaves]
    grid_spec = pltpu.PrefetchScalarGridSpec(
        num_scalar_prefetch=2,
        grid=(bs,),
        in_specs=[pl.BlockSpec((1, n_pad, feat), lambda b, *_: (b, 0, 0)),
                  pl.BlockSpec((1, n_pad, 3), lambda b, *_: (b, 0, 0)),
                  pl.BlockSpec((1, k_pad, feat), lambda b, *_: (b, 0, 0)),
                  pl.BlockSpec((1, k_pad, 3), lambda b, *_: (b, 0, 0)),
                  pl.BlockSpec((1, k_pad, 1), lambda b, *_: (b, 0, 0))] + wspecs,
        out_specs=(pl.BlockSpec((1, m_pad, n_rel), lambda b, *_: (b, 0, 0)),
                   pl.BlockSpec((1, n_pad, n_rel * feat), lambda b, *_: (b, 0, 0))),
    )
    hid = params['layers'][0]['w'].shape[1]
    w_bytes = sum(int(np.prod(l.shape)) * 4 for l in leaves)
    est = (w_bytes * 2 + m_pad * hid * 4 * 6 + n_pad * m_pad * 4 * 3
           + m_pad * (n_pad + k_pad + feat + 16) * 4)
    plog, ctx = pl.pallas_call(
        kernel,
        out_shape=(jax.ShapeDtypeStruct((bs, m_pad, n_rel), jnp.float32),
                   jax.ShapeDtypeStruct((bs, n_pad, n_rel * feat), jnp.float32)),
        grid_spec=grid_spec,
        compiler_params=pltpu.CompilerParams(
            dimension_semantics=("parallel",),
            vmem_limit_bytes=_vmem_limit(est)),
    )(ncounts, kcounts, x_pad, coords_pad, topk_feat, topk_coord, relate_k, *leaves)
    return plog, ctx


# ---------------- tiled linear kernels (1x1 Conv3d resize layers) ----------------

def _pick_tm(M):
    for cand in (512, 256, 128):
        if M % cand == 0:
            return cand
    return 128


def _linear_kernel(x_ref, w_ref, b_ref, o_ref):
    acc = _mm(x_ref[...], w_ref[...])
    o_ref[...] = (acc + b_ref[...]).astype(o_ref.dtype)


def linear_pallas(x, w, b, tm=None):
    """x: (M, K), w: (K, N), b: (N,) -> (M, N), all f32 (bf16 on the MXU)."""
    M, K = x.shape
    N = w.shape[1]
    tm = tm or _pick_tm(M)
    m_pad = ((M + tm - 1) // tm) * tm
    x_p = x if m_pad == M else jnp.pad(x, ((0, m_pad - M), (0, 0)))
    out = pl.pallas_call(
        _linear_kernel,
        out_shape=jax.ShapeDtypeStruct((m_pad, N), jnp.float32),
        grid=(m_pad // tm,),
        in_specs=[pl.BlockSpec((tm, K), lambda i: (i, 0)),
                  pl.BlockSpec((K, N), lambda i: (0, 0)),
                  pl.BlockSpec((1, N), lambda i: (0, 0))],
        out_specs=pl.BlockSpec((tm, N), lambda i: (i, 0)),
        compiler_params=pltpu.CompilerParams(dimension_semantics=("parallel",)),
    )(x_p, w, b.reshape(1, N))
    return out if m_pad == M else out[:M]


def _cat_linear_kernel(xa_ref, xb_ref, wa_ref, wb_ref, b_ref, o_ref):
    acc = _mm(xa_ref[...], wa_ref[...]) + _mm(xb_ref[...], wb_ref[...])
    o_ref[...] = (acc + b_ref[...]).astype(o_ref.dtype)


def concat_linear_pallas(xa, xb, w, b, tm=None):
    """concat([xa, xb], -1) @ w + b without materializing the concat in HBM."""
    M, Ka = xa.shape
    Kb = xb.shape[1]
    N = w.shape[1]
    wa, wb = w[:Ka], w[Ka:]
    tm = tm or _pick_tm(M)
    m_pad = ((M + tm - 1) // tm) * tm
    if m_pad != M:
        xa = jnp.pad(xa, ((0, m_pad - M), (0, 0)))
        xb = jnp.pad(xb, ((0, m_pad - M), (0, 0)))
    out = pl.pallas_call(
        _cat_linear_kernel,
        out_shape=jax.ShapeDtypeStruct((m_pad, N), jnp.float32),
        grid=(m_pad // tm,),
        in_specs=[pl.BlockSpec((tm, Ka), lambda i: (i, 0)),
                  pl.BlockSpec((tm, Kb), lambda i: (i, 0)),
                  pl.BlockSpec((Ka, N), lambda i: (0, 0)),
                  pl.BlockSpec((Kb, N), lambda i: (0, 0)),
                  pl.BlockSpec((1, N), lambda i: (0, 0))],
        out_specs=pl.BlockSpec((tm, N), lambda i: (i, 0)),
        compiler_params=pltpu.CompilerParams(dimension_semantics=("parallel",)),
    )(xa, xb, wa, wb, b.reshape(1, N))
    return out if m_pad == M else out[:M]


# ---------------- parameter construction ----------------

def positionalencoding1d(d_model, length):
    if d_model % 2 != 0:
        raise ValueError("d_model must be even")
    position = jnp.arange(length, dtype=jnp.float32)[:, None]
    div_term = jnp.exp(jnp.arange(0, d_model, 2, dtype=jnp.float32)
                       * -(math.log(10000.0) / d_model))
    pe = jnp.zeros((length, d_model), jnp.float32)
    pe = pe.at[:, 0::2].set(jnp.sin(position * div_term))
    pe = pe.at[:, 1::2].set(jnp.cos(position * div_term))
    return pe


def init_linear(key, fin, fout):
    kw, kb = jax.random.split(key)
    lim = 1.0 / math.sqrt(fin)
    w = jax.random.uniform(kw, (fin, fout), jnp.float32, -lim, lim)
    b = jax.random.uniform(kb, (fout,), jnp.float32, -lim, lim)
    return w, b


def init_mlp(key, in_channels, feature, dim_coords, dim_project, out_channels, n_layers):
    keys = jax.random.split(key, n_layers + 3)

    def lin2d(k, fi, fo):
        w, b = init_linear(k, fi, fo)
        return w, b.reshape(1, fo)

    p = {}
    p['proj0_w'], p['proj0_b'] = lin2d(keys[0], dim_coords, dim_project)
    p['proj0_g'] = jnp.ones((1, dim_project), jnp.float32)
    p['proj0_be'] = jnp.zeros((1, dim_project), jnp.float32)
    p['proj1_w'], p['proj1_b'] = lin2d(keys[1], dim_project, dim_project)
    p['proj1_g'] = jnp.ones((1, dim_project), jnp.float32)
    p['proj1_be'] = jnp.zeros((1, dim_project), jnp.float32)
    layers = []
    for layer in range(n_layers):
        in_f = in_channels if layer == 0 else feature
        if layer == n_layers // 2:
            in_f += dim_project
        w, b = lin2d(keys[2 + layer], in_f, feature)
        layers.append({'w': w, 'b': b,
                       'g': jnp.ones((1, feature), jnp.float32),
                       'be': jnp.zeros((1, feature), jnp.float32)})
    p['layers'] = layers
    p['out_w'], p['out_b'] = lin2d(keys[-1], feature, out_channels)
    return p


def init_params(key, in_channels, out_channels, feature, size, n_relations=5):
    ks = jax.random.split(key, 4)
    L = size[0] * size[1] * size[2]
    p = {'feature': feature, 'n_relations': n_relations}
    p['resize_in'] = (init_linear(ks[0], in_channels, feature)
                      if in_channels != feature else None)
    p['relate'] = init_mlp(ks[1], feature, 256, 3, 32, 1, n_layers=4)
    p['P'] = init_mlp(ks[2], feature, 256, 6, 64, n_relations, n_layers=6)
    p['resize'] = (init_linear(ks[3], feature * (n_relations + 1), out_channels)
                   if feature * (n_relations + 1) != out_channels else None)
    p['pe'] = positionalencoding1d(feature, L)
    return p


# ---------------- forward ----------------

def cp_implicit_pairwise_forward(params, x, masks, pts_cam, max_k, key):
    bs, cin, h, w, d = x.shape
    L = h * w * d
    feat = params['feature']
    n_rel = params['n_relations']

    x_lc = jnp.transpose(x.reshape(bs, cin, L), (0, 2, 1))               # (bs, L, cin)
    if params['resize_in'] is not None:
        xin = linear_pallas(x_lc.reshape(bs * L, cin),
                            *params['resize_in']).reshape(bs, L, feat)
    else:
        xin = x_lc
    x_agg = xin   # TODO(synk): Bottleneck3D `agg` has no provided definition -> identity
    _ = params['pe']   # dead in the original forward; kept for fidelity

    # host-side index preparation (masks drive control flow, like in torch)
    masks_np = np.asarray(masks)
    idx_list = [np.nonzero(masks_np[i])[0].astype(np.int32) for i in range(bs)]
    n_list = [int(ix.shape[0]) for ix in idx_list]
    n_max = max(n_list)
    if n_max == 0:
        raise ValueError("CPImplicitPairwise: all masks are empty")
    k_list = [int(min(max(n, 1), max_k)) for n in n_list]
    n_pad = max(8, -(-n_max // 8) * 8)
    k_pad = max(8, -(-max(k_list) // 8) * 8)

    idx_pad_np = np.zeros((bs, n_pad), np.int32)
    for i in range(bs):
        idx_pad_np[i, :n_list[i]] = idx_list[i]
    idx_pad = jnp.asarray(idx_pad_np)
    valid_n = jnp.asarray(np.arange(n_pad)[None, :] < np.asarray(n_list)[:, None])
    valid_k = jnp.asarray(np.arange(k_pad)[None, :] < np.asarray(k_list)[:, None])
    ncounts = jnp.asarray(n_list, jnp.int32)
    kcounts = jnp.asarray(k_list, jnp.int32)

    xi_pad = jnp.take_along_axis(xin, idx_pad[:, :, None], axis=1)       # (bs, n_pad, feat)
    coords_pad = jnp.take_along_axis(pts_cam, idx_pad[:, :, None], axis=1)

    # fused relate MLP (whole batch, one kernel)
    relate_logit = relate_mlp_pallas(params['relate'], xi_pad, coords_pad, ncounts)
    relate_prob = jax.nn.sigmoid(relate_logit[..., 0])                   # (bs, n_pad)

    # multinomial(replacement=True) == categorical on log-sigmoid logits
    logp = jnp.where(valid_n, jax.nn.log_sigmoid(relate_logit[..., 0]), -jnp.inf)
    key, sk = jax.random.split(key)
    topk = jax.random.categorical(sk, logp, axis=-1,
                                  shape=(k_pad, bs)).T.astype(jnp.int32)  # (bs, k_pad)

    topk_feat = jnp.take_along_axis(xi_pad, topk[:, :, None], axis=1)     # (bs, k_pad, feat)
    topk_coord = jnp.take_along_axis(coords_pad, topk[:, :, None], axis=1)
    relate_k = jnp.take_along_axis(relate_prob, topk, axis=1)             # (bs, k_pad)
    relate_k = jnp.where(valid_k, relate_k, 0.0)[:, :, None]              # (bs, k_pad, 1)

    # fused pairwise P MLP + softmax/weighting/aggregation/normalization
    P_logit_pad, ctx_pad = p_mlp_context_pallas(
        params['P'], xi_pad, coords_pad, topk_feat, topk_coord, relate_k,
        ncounts, kcounts)

    # single batched scatter back into the dense voxel grid
    ctx_valid = jnp.where(valid_n[:, :, None], ctx_pad, 0.0)
    x_context = jax.vmap(
        lambda idx, v: jnp.zeros((L, n_rel * feat), jnp.float32).at[idx].add(v)
    )(idx_pad, ctx_valid)                                                 # (bs, L, n_rel*feat)

    # final resize: torch.cat([input, x_context]) fused into a split-weight matmul
    if params['resize'] is not None:
        out = concat_linear_pallas(
            xin.reshape(bs * L, feat),
            x_context.reshape(bs * L, n_rel * feat),
            *params['resize']).reshape(bs, L, -1)
    else:
        out = jnp.concatenate([xin, x_context], axis=-1)

    relate_probs = [relate_prob[i, :n_list[i]] for i in range(bs)]
    topk_list = [topk[i, :k_list[i]] for i in range(bs)]
    P_logits = [
        P_logit_pad[i].reshape(n_pad, k_pad, n_rel)[:n_list[i], :k_list[i], :]
        .reshape(n_list[i] * k_list[i], n_rel)
        for i in range(bs)
    ]

    return {
        'relate_probs': relate_probs,
        'x_agg': jnp.transpose(x_agg, (0, 2, 1)).reshape(bs, feat, h, w, d),
        'P_logits': P_logits,
        'topk_indices': topk_list,
        'x': jnp.transpose(out, (0, 2, 1)).reshape(bs, -1, h, w, d),
    }


if __name__ == "__main__":
    key = jax.random.PRNGKey(0)
    bs, in_ch, feature, out_ch = 2, 16, 32, 64
    h = w = d = 8
    size = (h, w, d)
    L = h * w * d
    max_k = 16
    n_valid = 64          # non-empty voxels per batch item

    kp, kx, km, kc, ks = jax.random.split(key, 5)
    params = init_params(kp, in_ch, out_ch, feature, size, n_relations=5)

    x = jax.random.normal(kx, (bs, in_ch, h, w, d), jnp.float32)
    masks = []
    for i in range(bs):
        perm = jax.random.permutation(jax.random.fold_in(km, i), L)[:n_valid]
        masks.append(jnp.zeros((L,), jnp.bool_).at[perm].set(True))
    masks = jnp.stack(masks)                                    # (bs, L) boolean
    pts_cam = jax.random.normal(kc, (bs, L, 3), jnp.float32)    # (bs, L, 3) camera coords

    ret = cp_implicit_pairwise_forward(params, x, masks, pts_cam, max_k, ks)
    jax.block_until_ready(ret['x'])
    assert ret['x'].shape == (bs, out_ch, h, w, d)
    assert ret['x_agg'].shape == (bs, feature, h, w, d)
    print("KERNEL_OK")
</pallas_src>

<mosaic_0001>
module attributes {stable_mosaic.version = 11 : i64} {
  func.func @_linear_kernel(%arg0: i32, %arg1: memref<512x16xf32, #tpu.memory_space<vmem>>, %arg2: memref<16x32xf32, #tpu.memory_space<vmem>>, %arg3: memref<1x32xf32, #tpu.memory_space<vmem>>, %arg4: memref<512x32xf32, #tpu.memory_space<vmem>>) attributes {dimension_semantics = [#tpu.dimension_semantics<parallel>], iteration_bounds = array<i64: 2>, scalar_prefetch = 0 : i64, scratch_operands = 0 : i64, tpu.core_type = #tpu.core_type<tc>, window_params = [{transform_indices = @transform_0, window_bounds = array<i64: 512, 16>}, {pipeline_mode = #tpu.pipeline_mode<synchronous>, transform_indices = @transform_1, window_bounds = array<i64: 16, 32>}, {pipeline_mode = #tpu.pipeline_mode<synchronous>, transform_indices = @transform_2, window_bounds = array<i64: 1, 32>}, {transform_indices = @transform_3, window_bounds = array<i64: 512, 32>}]} {
    %c0 = arith.constant 0 : index
    %c0_0 = arith.constant 0 : index
    %0 = vector.load %arg1[%c0, %c0_0] : memref<512x16xf32, #tpu.memory_space<vmem>>, vector<512x16xf32>
    %c0_1 = arith.constant 0 : index
    %c0_2 = arith.constant 0 : index
    %1 = vector.load %arg2[%c0_1, %c0_2] : memref<16x32xf32, #tpu.memory_space<vmem>>, vector<16x32xf32>
    %2 = arith.truncf %0 : vector<512x16xf32> to vector<512x16xbf16>
    %3 = arith.truncf %1 : vector<16x32xf32> to vector<16x32xbf16>
    %cst = arith.constant dense<0.000000e+00> : vector<512x32xf32>
    %4 = tpu.matmul %2, %3, %cst {dimension_numbers = #tpu.dot_dimension_numbers<[1], [0], [0], [1], [0, 0, 1, 1], [], []>} : vector<512x16xbf16>, vector<16x32xbf16>, vector<512x32xf32> -> vector<512x32xf32>
    %c0_3 = arith.constant 0 : index
    %c0_4 = arith.constant 0 : index
    %5 = vector.load %arg3[%c0_3, %c0_4] : memref<1x32xf32, #tpu.memory_space<vmem>>, vector<1x32xf32>
    %6 = vector.broadcast %5 : vector<1x32xf32> to vector<512x32xf32>
    %7 = arith.addf %4, %6 : vector<512x32xf32>
    %c0_5 = arith.constant 0 : index
    %c0_6 = arith.constant 0 : index
    %8 = vector.load %arg4[%c0_5, %c0_6] : memref<512x32xf32, #tpu.memory_space<vmem>>, vector<512x32xf32>
    tpu.vector_store %arg4[%c0_5, %c0_6], %7 {strides = array<i32>} : memref<512x32xf32, #tpu.memory_space<vmem>>, vector<512x32xf32>,
    return
  }
  func.func @transform_0(%arg0: i32) -> (i32, i32) {
    %c0_i32 = arith.constant 0 : i32
    %c0_i32_0 = arith.constant 0 : i32
    return %arg0, %c0_i32 : i32, i32
  }
  func.func @transform_1(%arg0: i32) -> (i32, i32) {
    %c0_i32 = arith.constant 0 : i32
    %c0_i32_0 = arith.constant 0 : i32
    %c0_i32_1 = arith.constant 0 : i32
    return %c0_i32, %c0_i32_0 : i32, i32
  }
  func.func @transform_2(%arg0: i32) -> (i32, i32) {
    %c0_i32 = arith.constant 0 : i32
    %c0_i32_0 = arith.constant 0 : i32
    %c0_i32_1 = arith.constant 0 : i32
    return %c0_i32, %c0_i32_0 : i32, i32
  }
  func.func @transform_3(%arg0: i32) -> (i32, i32) {
    %c0_i32 = arith.constant 0 : i32
    %c0_i32_0 = arith.constant 0 : i32
    return %arg0, %c0_i32 : i32, i32
  }
}

</mosaic_0001>

<bundles_post_ra>
// kernel: tpu_custom_call.1
= control target key start
LH: loop header
LB: loop body
LE: loop exit
PB: predicated region body
PF: predicated region fallthrough
CT: control target
= control target key end

     0   :  { %s969_s12 = smov 0   ;;  %s1296_s0 = inlined_call_operand.vmem [shape: f32[1024,16], index: 0, kind: input, shape index: {}]   ;;  %s1297_s1 = inlined_call_operand.vmem [shape: f32[16,32], index: 1, kind: input, shape index: {}]   ;;  %s1298_s2 = inlined_call_operand.vmem [shape: f32[1,32], index: 2, kind: input, shape index: {}]   ;;  %s1299_s3 = inlined_call_operand.vmem [shape: f32[1024,32], index: 3, kind: output, shape index: {}]  }
   0x1 LB: > { %s788_s13 = sadd.s32 4294967295, %s947_s12   ;;  %p792_p0 = scmp.ge.s32.totalorder %s947_s12, 1  ;;  %s947_s12 = sphi %s969_s12, %s13_s12  }
   0x2   : > { %p138_p1 = scmp.lt.s32.totalorder %s947_s12, 3 }
   0x4   : > { %p139_p2 = pnand %p792_p0, %p138_p1 }
   0x5   : > { %v239_v0 = vld [vmem:[%s1297_s1] sm:$0xff] (!%p139_p2)  ;;  %v240_v1 = vld [vmem:[%s1297_s1 + $0x8] sm:$0xff] (!%p139_p2)  ;;  %s793_s18 = sshll.u32 (!%p139_p2), %s788_s13, 6  ;;  %vm281_vm0 = vcmask (!%p139_p2), 130048   ;;  %vm667_vm1 = vcmask (!%p139_p2), 261120  }
   0x6   : > { %142 = sbr.rel (%p139_p2) target bundleno = 295 (0x127), region = 32  ;;  %v273_v2 = vpack.c.bf16 (!%p139_p2), %v240_v1, %v239_v0  ;;  %p163_p3 = scmp.lt.s32.totalorder (!%p139_p2), %s793_s18, 127 }
   0x8   : > { %865 = vmatprep.subr.bf16.mxu0 (!%p139_p2), %v273_v2  ;;  %931 = vmatprep.subr.bf16.mxu1 (!%p139_p2), %v273_v2 }
   0x9   : > { %866 = vmatpush3.bf16.msra.mxu0 (!%p139_p2), %v273_v2  ;;  %932 = vmatpush3.bf16.msra.mxu1 (!%p139_p2), %v273_v2 }
   0xd   : > { %s1301_s18 = smov (!%p163_p3, %s793_s18), 127 }
   0xe   : > { %s794_s19 = sshll.u32 %s1301_s18, 3 }
   0xf   : > { %s991_s22 = scalar_lea.vmem %s1296_s0, %s794_s19  ;;  %s1099_s27 = scalar_lea.vmem %s1299_s3, %s794_s19 }
  0x10   : > { %v175_v3 = vld [vmem:[%s991_s22] sm:$0xff]  ;;  %v176_v4 = vld [vmem:[%s991_s22 + $0x8] sm:$0xff]  ;;  %v177_v8 = vld [vmem:[%s991_s22 + $0x10] sm:$0xff] }
  0x11   : > { %v207_v5 = vld [vmem:[%s991_s22 + $0x100] sm:$0xff]  ;;  %v241_v6 = vpack.c.bf16 %v176_v4, %v175_v3  ;;  %v208_v7 = vld [vmem:[%s991_s22 + $0x108] sm:$0xff]  ;;  %v178_v9 = vld [vmem:[%s991_s22 + $0x18] sm:$0xff] }
  0x12   : > { %v257_v10 = vpack.c.bf16 %v208_v7, %v207_v5  ;;  %v242_v11 = vpack.c.bf16 %v178_v9, %v177_v8  ;;  %v209_v12 = vld [vmem:[%s991_s22 + $0x110] sm:$0xff]  ;;  %v210_v13 = vld [vmem:[%s991_s22 + $0x118] sm:$0xff]  ;;  %v179_v14 = vld [vmem:[%s991_s22 + $0x20] sm:$0xff] }
  0x13   : > { %867 = vmatprep.mubr.msk.bf16.mxu0 %vm281_vm0, %v241_v6  ;;  %v258_v15 = vpack.c.bf16 %v210_v13, %v209_v12  ;;  %v180_v16 = vld [vmem:[%s991_s22 + $0x28] sm:$0xff]  ;;  %v211_v17 = vld [vmem:[%s991_s22 + $0x120] sm:$0xff]  ;;  %v181_v21 = vld [vmem:[%s991_s22 + $0x30] sm:$0xff] }
  0x14   : > { %v212_v18 = vld [vmem:[%s991_s22 + $0x128] sm:$0xff]  ;;  %899 = vmatprep.mubr.msk.bf16.mxu1 %vm281_vm0, %v257_v10  ;;  %868 = vmatmul.mubr.msk.bf16.vlgmr.msra.gmra.mrb[0].mxu0 %vm281_vm0, %v242_v11  ;;  %v243_v19 = vpack.c.bf16 %v180_v16, %v179_v14  ;;  %v182_v22 = vld [vmem:[%s991_s22 + $0x38] sm:$0xff]  ;;  %v213_v23 = vld [vmem:[%s991_s22 + $0x130] sm:$0xff] }
  0x15   : > { %v259_v20 = vpack.c.bf16 %v212_v18, %v211_v17  ;;  %900 = vmatmul.mubr.msk.bf16.vlgmr.msra.gmra.mrb[0].mxu1 %vm281_vm0, %v258_v15  ;;  %v214_v24 = vld [vmem:[%s991_s22 + $0x138] sm:$0xff]  ;;  %v183_v25 = vld [vmem:[%s991_s22 + $0x40] sm:$0xff]  ;;  %v184_v26 = vld [vmem:[%s991_s22 + $0x48] sm:$0xff]  ;;  %v244_v29 = vpack.c.bf16 %v182_v22, %v181_v21 }
  0x16   : > { %871 = vmatprep.mubr.msk.bf16.mxu0 %vm281_vm0, %v243_v19  ;;  %v215_v27 = vld [vmem:[%s991_s22 + $0x140] sm:$0xff]  ;;  %v216_v28 = vld [vmem:[%s991_s22 + $0x148] sm:$0xff]  ;;  %v260_v30 = vpack.c.bf16 %v214_v24, %v213_v23  ;;  %v245_v31 = vpack.c.bf16 %v184_v26, %v183_v25  ;;  %v185_v33 = vld [vmem:[%s991_s22 + $0x50] sm:$0xff] }
  0x17   : > { %903 = vmatprep.mubr.msk.bf16.mxu1 %vm281_vm0, %v259_v20  ;;  %v261_v32 = vpack.c.bf16 %v216_v28, %v215_v27  ;;  %v186_v34 = vld [vmem:[%s991_s22 + $0x58] sm:$0xff]  ;;  %v217_v35 = vld [vmem:[%s991_s22 + $0x150] sm:$0xff]  ;;  %v187_v37 = vld [vmem:[%s991_s22 + $0x60] sm:$0xff] }
  0x18   : > { %v218_v36 = vld [vmem:[%s991_s22 + $0x158] sm:$0xff]  ;;  %v188_v38 = vld [vmem:[%s991_s22 + $0x68] sm:$0xff]  ;;  %v219_v39 = vld [vmem:[%s991_s22 + $0x160] sm:$0xff]  ;;  %v246_v41 = vpack.c.bf16 %v186_v34, %v185_v33 }
  0x19   : > { %v220_v40 = vld [vmem:[%s991_s22 + $0x168] sm:$0xff]  ;;  %v262_v42 = vpack.c.bf16 %v218_v36, %v217_v35  ;;  %v247_v43 = vpack.c.bf16 %v188_v38, %v187_v37  ;;  %v189_v45 = vld [vmem:[%s991_s22 + $0x70] sm:$0xff]  ;;  %v190_v46 = vld [vmem:[%s991_s22 + $0x78] sm:$0xff] }
  0x1a   : > { %v263_v44 = vpack.c.bf16 %v220_v40, %v219_v39  ;;  %v221_v47 = vld [vmem:[%s991_s22 + $0x170] sm:$0xff]  ;;  %v222_v48 = vld [vmem:[%s991_s22 + $0x178] sm:$0xff]  ;;  %v191_v49 = vld [vmem:[%s991_s22 + $0x80] sm:$0xff]  ;;  %v248_v53 = vpack.c.bf16 %v190_v46, %v189_v45 }
  0x1b   : > { %v192_v50 = vld [vmem:[%s991_s22 + $0x88] sm:$0xff]  ;;  %v223_v51 = vld [vmem:[%s991_s22 + $0x180] sm:$0xff]  ;;  %v264_v54 = vpack.c.bf16 %v222_v48, %v221_v47  ;;  %v193_v57 = vld [vmem:[%s991_s22 + $0x90] sm:$0xff] }
  0x1c   : > { %872 = vmatmul.mubr.msk.bf16.gmra.mrb[4].mxu0 %vm281_vm0, %v244_v29  ;;  %v224_v52 = vld [vmem:[%s991_s22 + $0x188] sm:$0xff]  ;;  %v249_v55 = vpack.c.bf16 %v192_v50, %v191_v49  ;;  %v194_v58 = vld [vmem:[%s991_s22 + $0x98] sm:$0xff]  ;;  %v225_v59 = vld [vmem:[%s991_s22 + $0x190] sm:$0xff] }
  0x1d   : > { %904 = vmatmul.mubr.msk.bf16.gmra.mrb[4].mxu1 %vm281_vm0, %v260_v30  ;;  %875 = vmatprep.mubr.msk.bf16.mxu0 %vm281_vm0, %v245_v31  ;;  %v265_v56 = vpack.c.bf16 %v224_v52, %v223_v51  ;;  %v226_v60 = vld [vmem:[%s991_s22 + $0x198] sm:$0xff]  ;;  %v195_v61 = vld [vmem:[%s991_s22 + $0xa0] sm:$0xff]  ;;  %v196_v62 = vld [vmem:[%s991_s22 + $0xa8] sm:$0xff]  ;;  %v250_v1 = vpack.c.bf16 %v194_v58, %v193_v57 }
  0x1e   : > { %907 = vmatprep.mubr.msk.bf16.mxu1 %vm281_vm0, %v261_v32  ;;  %v227_v63 = vld [vmem:[%s991_s22 + $0x1a0] sm:$0xff]  ;;  %v228_v0 = vld [vmem:[%s991_s22 + $0x1a8] sm:$0xff]  ;;  %v266_v2 = vpack.c.bf16 %v226_v60, %v225_v59  ;;  %v251_v3 = vpack.c.bf16 %v196_v62, %v195_v61  ;;  %v197_v5 = vld [vmem:[%s991_s22 + $0xb0] sm:$0xff] }
  0x1f   : > { %v267_v4 = vpack.c.bf16 %v228_v0, %v227_v63  ;;  %v198_v6 = vld [vmem:[%s991_s22 + $0xb8] sm:$0xff]  ;;  %v229_v7 = vld [vmem:[%s991_s22 + $0x1b0] sm:$0xff]  ;;  %v199_v9 = vld [vmem:[%s991_s22 + $0xc0] sm:$0xff] }
  0x20   : > { %v230_v8 = vld [vmem:[%s991_s22 + $0x1b8] sm:$0xff]  ;;  %v200_v10 = vld [vmem:[%s991_s22 + $0xc8] sm:$0xff]  ;;  %v231_v11 = vld [vmem:[%s991_s22 + $0x1c0] sm:$0xff]  ;;  %v252_v13 = vpack.c.bf16 %v198_v6, %v197_v5 }
  0x21   : > { %v232_v12 = vld [vmem:[%s991_s22 + $0x1c8] sm:$0xff]  ;;  %v268_v14 = vpack.c.bf16 %v230_v8, %v229_v7  ;;  %v253_v15 = vpack.c.bf16 %v200_v10, %v199_v9  ;;  %v201_v17 = vld [vmem:[%s991_s22 + $0xd0] sm:$0xff]  ;;  %v202_v18 = vld [vmem:[%s991_s22 + $0xd8] sm:$0xff] }
  0x22   : > { %v269_v16 = vpack.c.bf16 %v232_v12, %v231_v11  ;;  %v233_v19 = vld [vmem:[%s991_s22 + $0x1d0] sm:$0xff]  ;;  %v234_v20 = vld [vmem:[%s991_s22 + $0x1d8] sm:$0xff]  ;;  %v203_v21 = vld [vmem:[%s991_s22 + $0xe0] sm:$0xff]  ;;  %v254_v25 = vpack.c.bf16 %v202_v18, %v201_v17 }
  0x23   : > { %v204_v22 = vld [vmem:[%s991_s22 + $0xe8] sm:$0xff]  ;;  %v235_v23 = vld [vmem:[%s991_s22 + $0x1e0] sm:$0xff]  ;;  %v270_v26 = vpack.c.bf16 %v234_v20, %v233_v19  ;;  %v205_v29 = vld [vmem:[%s991_s22 + $0xf0] sm:$0xff] }
  0x24   : > { %876 = vmatmul.mubr.msk.bf16.gmra.mrb[8].mxu0 %vm281_vm0, %v246_v41  ;;  %v236_v24 = vld [vmem:[%s991_s22 + $0x1e8] sm:$0xff]  ;;  %v255_v27 = vpack.c.bf16 %v204_v22, %v203_v21  ;;  %v206_v30 = vld [vmem:[%s991_s22 + $0xf8] sm:$0xff]  ;;  %v237_v31 = vld [vmem:[%s991_s22 + $0x1f0] sm:$0xff] }
  0x25   : > { %908 = vmatmul.mubr.msk.bf16.gmra.mrb[8].mxu1 %vm281_vm0, %v262_v42  ;;  %879 = vmatprep.mubr.msk.bf16.mxu0 %vm281_vm0, %v247_v43  ;;  %v271_v28 = vpack.c.bf16 %v236_v24, %v235_v23  ;;  %v238_v32 = vld [vmem:[%s991_s22 + $0x1f8] sm:$0xff]  ;;  %v256_v33 = vpack.c.bf16 %v206_v30, %v205_v29  ;;  %v1092_v35 = vld [vmem:[%s1298_s2] ss:$0 sm:$0xff] }
  0x26   : > { %911 = vmatprep.mubr.msk.bf16.mxu1 %vm281_vm0, %v263_v44  ;;  %v272_v34 = vpack.c.bf16 %v238_v32, %v237_v31 }
  0x2c   : > { %880 = vmatmul.mubr.msk.bf16.gmra.mrb[12].mxu0 %vm281_vm0, %v248_v53 }
  0x2d   : > { %912 = vmatmul.mubr.msk.bf16.gmra.mrb[12].mxu1 %vm281_vm0, %v264_v54  ;;  %883 = vmatprep.mubr.msk.bf16.mxu0 %vm281_vm0, %v249_v55 }
  0x2e   : > { %915 = vmatprep.mubr.msk.bf16.mxu1 %vm281_vm0, %v265_v56 }
  0x34   : > { %884 = vmatmul.mubr.msk.bf16.gmra.mrb[16].mxu0 %vm281_vm0, %v250_v1 }
  0x35   : > { %916 = vmatmul.mubr.msk.bf16.gmra.mrb[16].mxu1 %vm281_vm0, %v266_v2  ;;  %887 = vmatprep.mubr.msk.bf16.mxu0 %vm281_vm0, %v251_v3 }
  0x36   : > { %919 = vmatprep.mubr.msk.bf16.mxu1 %vm281_vm0, %v267_v4 }
  0x3c   : > { %888 = vmatmul.mubr.msk.bf16.gmra.mrb[20].mxu0 %vm281_vm0, %v252_v13 }
  0x3d   : > { %920 = vmatmul.mubr.msk.bf16.gmra.mrb[20].mxu1 %vm281_vm0, %v268_v14  ;;  %891 = vmatprep.mubr.msk.bf16.mxu0 %vm281_vm0, %v253_v15 }
  0x3e   : > { %923 = vmatprep.mubr.msk.bf16.mxu1 %vm281_vm0, %v269_v16 }
  0x44   : > { %892 = vmatmul.mubr.msk.bf16.gmra.mrb[24].mxu0 %vm281_vm0, %v254_v25 }
  0x45   : > { %924 = vmatmul.mubr.msk.bf16.gmra.mrb[24].mxu1 %vm281_vm0, %v270_v26  ;;  %895 = vmatprep.mubr.msk.bf16.mxu0 %vm281_vm0, %v255_v27 }
  0x46   : > { %927 = vmatprep.mubr.msk.bf16.mxu1 %vm281_vm0, %v271_v28 }
  0x4c   : > { %896 = vmatmul.mubr.msk.bf16.gmra.mrb[28].mxu0 %vm281_vm0, %v256_v33 }
  0x4d   : > { %928 = vmatmul.mubr.msk.bf16.gmra.mrb[28].mxu1 %vm281_vm0, %v272_v34 }
  0xe7   : > { %v869_v36 = vpop.f32.mrb[0].mxu0 }
  0xe8   : > { %v421_v37 = vadd.f32 %v869_v36, %v1092_v35  ;;  %v901_v38 = vpop.f32.mrb[0].mxu1  ;;  %v412_v39 = vpop.f32.mrb[1].mxu0 }
  0xe9   : > { %v549_v40 = vadd.f32 %v901_v38, %v1092_v35  ;;  %v413_v41 = vadd.f32 %v1092_v35, %v412_v39  ;;  %v540_v42 = vpop.f32.mrb[1].mxu1  ;;  %v870_v43 = vpop.f32.mrb[2].mxu0 }
  0xea   : > { %670 = vst.msk [vmem:[%s1099_s27 + $0x10] sm:$0xff] %vm667_vm1, %v421_v37  ;;  %v541_v44 = vadd.f32 %v1092_v35, %v540_v42  ;;  %v424_v45 = vadd.f32 %v870_v43, %v1092_v35  ;;  %v902_v46 = vpop.f32.mrb[2].mxu1  ;;  %v415_v47 = vpop.f32.mrb[3].mxu0 }
  0xeb   : > { %702 = vst.msk [vmem:[%s1099_s27 + $0x110] sm:$0xff] %vm667_vm1, %v549_v40  ;;  %668 = vst.msk [vmem:[%s1099_s27] sm:$0xff] %vm667_vm1, %v413_v41  ;;  %v552_v48 = vadd.f32 %v902_v46, %v1092_v35  ;;  %v416_v49 = vadd.f32 %v1092_v35, %v415_v47  ;;  %v543_v50 = vpop.f32.mrb[3].mxu1 }
  0xec   : > { %700 = vst.msk [vmem:[%s1099_s27 + $0x100] sm:$0xff] %vm667_vm1, %v541_v44  ;;  %671 = vst.msk [vmem:[%s1099_s27 + $0x18] sm:$0xff] %vm667_vm1, %v424_v45  ;;  %v544_v51 = vadd.f32 %v1092_v35, %v543_v50 }
  0xed   : > { %703 = vst.msk [vmem:[%s1099_s27 + $0x118] sm:$0xff] %vm667_vm1, %v552_v48  ;;  %669 = vst.msk [vmem:[%s1099_s27 + $0x8] sm:$0xff] %vm667_vm1, %v416_v49 }
  0xee   : > { %701 = vst.msk [vmem:[%s1099_s27 + $0x108] sm:$0xff] %vm667_vm1, %v544_v51 }
  0xef   : > { %v873_v52 = vpop.f32.mrb[4].mxu0 }
  0xf0   : > { %v437_v53 = vadd.f32 %v873_v52, %v1092_v35  ;;  %v905_v54 = vpop.f32.mrb[4].mxu1  ;;  %v428_v55 = vpop.f32.mrb[5].mxu0 }
  0xf1   : > { %v565_v56 = vadd.f32 %v905_v54, %v1092_v35  ;;  %v429_v57 = vadd.f32 %v1092_v35, %v428_v55  ;;  %v556_v58 = vpop.f32.mrb[5].mxu1  ;;  %v874_v59 = vpop.f32.mrb[6].mxu0 }
  0xf2   : > { %674 = vst.msk [vmem:[%s1099_s27 + $0x30] sm:$0xff] %vm667_vm1, %v437_v53  ;;  %v557_v60 = vadd.f32 %v1092_v35, %v556_v58  ;;  %v440_v61 = vadd.f32 %v874_v59, %v1092_v35  ;;  %v906_v62 = vpop.f32.mrb[6].mxu1  ;;  %v431_v63 = vpop.f32.mrb[7].mxu0 }
  0xf3   : > { %706 = vst.msk [vmem:[%s1099_s27 + $0x130] sm:$0xff] %vm667_vm1, %v565_v56  ;;  %672 = vst.msk [vmem:[%s1099_s27 + $0x20] sm:$0xff] %vm667_vm1, %v429_v57  ;;  %v568_v0 = vadd.f32 %v906_v62, %v1092_v35  ;;  %v432_v1 = vadd.f32 %v1092_v35, %v431_v63  ;;  %v559_v2 = vpop.f32.mrb[7].mxu1 }
  0xf4   : > { %704 = vst.msk [vmem:[%s1099_s27 + $0x120] sm:$0xff] %vm667_vm1, %v557_v60  ;;  %675 = vst.msk [vmem:[%s1099_s27 + $0x38] sm:$0xff] %vm667_vm1, %v440_v61  ;;  %v560_v3 = vadd.f32 %v1092_v35, %v559_v2 }
  0xf5   : > { %707 = vst.msk [vmem:[%s1099_s27 + $0x138] sm:$0xff] %vm667_vm1, %v568_v0  ;;  %673 = vst.msk [vmem:[%s1099_s27 + $0x28] sm:$0xff] %vm667_vm1, %v432_v1 }
  0xf6   : > { %705 = vst.msk [vmem:[%s1099_s27 + $0x128] sm:$0xff] %vm667_vm1, %v560_v3 }
  0xf7   : > { %v877_v4 = vpop.f32.mrb[8].mxu0 }
  0xf8   : > { %v453_v5 = vadd.f32 %v877_v4, %v1092_v35  ;;  %v909_v6 = vpop.f32.mrb[8].mxu1  ;;  %v444_v7 = vpop.f32.mrb[9].mxu0 }
  0xf9   : > { %v581_v8 = vadd.f32 %v909_v6, %v1092_v35  ;;  %v445_v9 = vadd.f32 %v1092_v35, %v444_v7  ;;  %v572_v10 = vpop.f32.mrb[9].mxu1  ;;  %v878_v11 = vpop.f32.mrb[10].mxu0 }
  0xfa   : > { %678 = vst.msk [vmem:[%s1099_s27 + $0x50] sm:$0xff] %vm667_vm1, %v453_v5  ;;  %v573_v12 = vadd.f32 %v1092_v35, %v572_v10  ;;  %v456_v13 = vadd.f32 %v878_v11, %v1092_v35  ;;  %v910_v14 = vpop.f32.mrb[10].mxu1  ;;  %v447_v15 = vpop.f32.mrb[11].mxu0 }
  0xfb   : > { %710 = vst.msk [vmem:[%s1099_s27 + $0x150] sm:$0xff] %vm667_vm1, %v581_v8  ;;  %676 = vst.msk [vmem:[%s1099_s27 + $0x40] sm:$0xff] %vm667_vm1, %v445_v9  ;;  %v584_v16 = vadd.f32 %v910_v14, %v1092_v35  ;;  %v448_v17 = vadd.f32 %v1092_v35, %v447_v15  ;;  %v575_v18 = vpop.f32.mrb[11].mxu1 }
  0xfc   : > { %708 = vst.msk [vmem:[%s1099_s27 + $0x140] sm:$0xff] %vm667_vm1, %v573_v12  ;;  %679 = vst.msk [vmem:[%s1099_s27 + $0x58] sm:$0xff] %vm667_vm1, %v456_v13  ;;  %v576_v19 = vadd.f32 %v1092_v35, %v575_v18 }
  0xfd   : > { %711 = vst.msk [vmem:[%s1099_s27 + $0x158] sm:$0xff] %vm667_vm1, %v584_v16  ;;  %677 = vst.msk [vmem:[%s1099_s27 + $0x48] sm:$0xff] %vm667_vm1, %v448_v17 }
  0xfe   : > { %709 = vst.msk [vmem:[%s1099_s27 + $0x148] sm:$0xff] %vm667_vm1, %v576_v19 }
  0xff   : > { %v881_v20 = vpop.f32.mrb[12].mxu0 }
 0x100   : > { %v469_v21 = vadd.f32 %v881_v20, %v1092_v35  ;;  %v913_v22 = vpop.f32.mrb[12].mxu1  ;;  %v460_v23 = vpop.f32.mrb[13].mxu0 }
 0x101   : > { %v597_v24 = vadd.f32 %v913_v22, %v1092_v35  ;;  %v461_v25 = vadd.f32 %v1092_v35, %v460_v23  ;;  %v588_v26 = vpop.f32.mrb[13].mxu1  ;;  %v882_v27 = vpop.f32.mrb[14].mxu0 }
 0x102   : > { %682 = vst.msk [vmem:[%s1099_s27 + $0x70] sm:$0xff] %vm667_vm1, %v469_v21  ;;  %v589_v28 = vadd.f32 %v1092_v35, %v588_v26  ;;  %v472_v29 = vadd.f32 %v882_v27, %v1092_v35  ;;  %v914_v30 = vpop.f32.mrb[14].mxu1  ;;  %v463_v31 = vpop.f32.mrb[15].mxu0 }
 0x103   : > { %714 = vst.msk [vmem:[%s1099_s27 + $0x170] sm:$0xff] %vm667_vm1, %v597_v24  ;;  %680 = vst.msk [vmem:[%s1099_s27 + $0x60] sm:$0xff] %vm667_vm1, %v461_v25  ;;  %v600_v32 = vadd.f32 %v914_v30, %v1092_v35  ;;  %v464_v33 = vadd.f32 %v1092_v35, %v463_v31  ;;  %v591_v34 = vpop.f32.mrb[15].mxu1 }
 0x104   : > { %712 = vst.msk [vmem:[%s1099_s27 + $0x160] sm:$0xff] %vm667_vm1, %v589_v28  ;;  %683 = vst.msk [vmem:[%s1099_s27 + $0x78] sm:$0xff] %vm667_vm1, %v472_v29  ;;  %v592_v36 = vadd.f32 %v1092_v35, %v591_v34 }
 0x105   : > { %715 = vst.msk [vmem:[%s1099_s27 + $0x178] sm:$0xff] %vm667_vm1, %v600_v32  ;;  %681 = vst.msk [vmem:[%s1099_s27 + $0x68] sm:$0xff] %vm667_vm1, %v464_v33 }
 0x106   : > { %713 = vst.msk [vmem:[%s1099_s27 + $0x168] sm:$0xff] %vm667_vm1, %v592_v36 }
 0x107   : > { %v885_v37 = vpop.f32.mrb[16].mxu0 }
 0x108   : > { %v485_v38 = vadd.f32 %v885_v37, %v1092_v35  ;;  %v917_v39 = vpop.f32.mrb[16].mxu1  ;;  %v476_v40 = vpop.f32.mrb[17].mxu0 }
 0x109   : > { %v613_v41 = vadd.f32 %v917_v39, %v1092_v35  ;;  %v477_v42 = vadd.f32 %v1092_v35, %v476_v40  ;;  %v604_v43 = vpop.f32.mrb[17].mxu1  ;;  %v886_v44 = vpop.f32.mrb[18].mxu0 }
 0x10a   : > { %686 = vst.msk [vmem:[%s1099_s27 + $0x90] sm:$0xff] %vm667_vm1, %v485_v38  ;;  %v605_v45 = vadd.f32 %v1092_v35, %v604_v43  ;;  %v488_v46 = vadd.f32 %v886_v44, %v1092_v35  ;;  %v918_v47 = vpop.f32.mrb[18].mxu1  ;;  %v479_v48 = vpop.f32.mrb[19].mxu0 }
 0x10b   : > { %718 = vst.msk [vmem:[%s1099_s27 + $0x190] sm:$0xff] %vm667_vm1, %v613_v41  ;;  %684 = vst.msk [vmem:[%s1099_s27 + $0x80] sm:$0xff] %vm667_vm1, %v477_v42  ;;  %v616_v49 = vadd.f32 %v918_v47, %v1092_v35  ;;  %v480_v50 = vadd.f32 %v1092_v35, %v479_v48  ;;  %v607_v51 = vpop.f32.mrb[19].mxu1 }
 0x10c   : > { %716 = vst.msk [vmem:[%s1099_s27 + $0x180] sm:$0xff] %vm667_vm1, %v605_v45  ;;  %687 = vst.msk [vmem:[%s1099_s27 + $0x98] sm:$0xff] %vm667_vm1, %v488_v46  ;;  %v608_v52 = vadd.f32 %v1092_v35, %v607_v51 }
 0x10d   : > { %719 = vst.msk [vmem:[%s1099_s27 + $0x198] sm:$0xff] %vm667_vm1, %v616_v49  ;;  %685 = vst.msk [vmem:[%s1099_s27 + $0x88] sm:$0xff] %vm667_vm1, %v480_v50 }
 0x10e   : > { %717 = vst.msk [vmem:[%s1099_s27 + $0x188] sm:$0xff] %vm667_vm1, %v608_v52 }
 0x10f   : > { %v889_v53 = vpop.f32.mrb[20].mxu0 }
 0x110   : > { %v501_v54 = vadd.f32 %v889_v53, %v1092_v35  ;;  %v921_v55 = vpop.f32.mrb[20].mxu1  ;;  %v492_v56 = vpop.f32.mrb[21].mxu0 }
 0x111   : > { %v629_v57 = vadd.f32 %v921_v55, %v1092_v35  ;;  %v493_v58 = vadd.f32 %v1092_v35, %v492_v56  ;;  %v620_v59 = vpop.f32.mrb[21].mxu1  ;;  %v890_v60 = vpop.f32.mrb[22].mxu0 }
 0x112   : > { %690 = vst.msk [vmem:[%s1099_s27 + $0xb0] sm:$0xff] %vm667_vm1, %v501_v54  ;;  %v621_v61 = vadd.f32 %v1092_v35, %v620_v59  ;;  %v504_v62 = vadd.f32 %v890_v60, %v1092_v35  ;;  %v922_v63 = vpop.f32.mrb[22].mxu1  ;;  %v495_v0 = vpop.f32.mrb[23].mxu0 }
 0x113   : > { %722 = vst.msk [vmem:[%s1099_s27 + $0x1b0] sm:$0xff] %vm667_vm1, %v629_v57  ;;  %688 = vst.msk [vmem:[%s1099_s27 + $0xa0] sm:$0xff] %vm667_vm1, %v493_v58  ;;  %v632_v1 = vadd.f32 %v922_v63, %v1092_v35  ;;  %v496_v2 = vadd.f32 %v1092_v35, %v495_v0  ;;  %v623_v3 = vpop.f32.mrb[23].mxu1 }
 0x114   : > { %720 = vst.msk [vmem:[%s1099_s27 + $0x1a0] sm:$0xff] %vm667_vm1, %v621_v61  ;;  %691 = vst.msk [vmem:[%s1099_s27 + $0xb8] sm:$0xff] %vm667_vm1, %v504_v62  ;;  %v624_v4 = vadd.f32 %v1092_v35, %v623_v3 }
 0x115   : > { %723 = vst.msk [vmem:[%s1099_s27 + $0x1b8] sm:$0xff] %vm667_vm1, %v632_v1  ;;  %689 = vst.msk [vmem:[%s1099_s27 + $0xa8] sm:$0xff] %vm667_vm1, %v496_v2 }
 0x116   : > { %721 = vst.msk [vmem:[%s1099_s27 + $0x1a8] sm:$0xff] %vm667_vm1, %v624_v4 }
 0x117   : > { %v893_v5 = vpop.f32.mrb[24].mxu0 }
 0x118   : > { %v517_v6 = vadd.f32 %v893_v5, %v1092_v35  ;;  %v925_v7 = vpop.f32.mrb[24].mxu1  ;;  %v508_v8 = vpop.f32.mrb[25].mxu0 }
 0x119   : > { %v645_v9 = vadd.f32 %v925_v7, %v1092_v35  ;;  %v509_v10 = vadd.f32 %v1092_v35, %v508_v8  ;;  %v636_v11 = vpop.f32.mrb[25].mxu1  ;;  %v894_v12 = vpop.f32.mrb[26].mxu0 }
 0x11a   : > { %694 = vst.msk [vmem:[%s1099_s27 + $0xd0] sm:$0xff] %vm667_vm1, %v517_v6  ;;  %v637_v13 = vadd.f32 %v1092_v35, %v636_v11  ;;  %v520_v14 = vadd.f32 %v894_v12, %v1092_v35  ;;  %v926_v15 = vpop.f32.mrb[26].mxu1  ;;  %v511_v16 = vpop.f32.mrb[27].mxu0 }
 0x11b   : > { %726 = vst.msk [vmem:[%s1099_s27 + $0x1d0] sm:$0xff] %vm667_vm1, %v645_v9  ;;  %692 = vst.msk [vmem:[%s1099_s27 + $0xc0] sm:$0xff] %vm667_vm1, %v509_v10  ;;  %v648_v17 = vadd.f32 %v926_v15, %v1092_v35  ;;  %v512_v18 = vadd.f32 %v1092_v35, %v511_v16  ;;  %v639_v19 = vpop.f32.mrb[27].mxu1 }
 0x11c   : > { %724 = vst.msk [vmem:[%s1099_s27 + $0x1c0] sm:$0xff] %vm667_vm1, %v637_v13  ;;  %695 = vst.msk [vmem:[%s1099_s27 + $0xd8] sm:$0xff] %vm667_vm1, %v520_v14  ;;  %v640_v20 = vadd.f32 %v1092_v35, %v639_v19 }
 0x11d   : > { %727 = vst.msk [vmem:[%s1099_s27 + $0x1d8] sm:$0xff] %vm667_vm1, %v648_v17  ;;  %693 = vst.msk [vmem:[%s1099_s27 + $0xc8] sm:$0xff] %vm667_vm1, %v512_v18 }
 0x11e   : > { %725 = vst.msk [vmem:[%s1099_s27 + $0x1c8] sm:$0xff] %vm667_vm1, %v640_v20 }
 0x11f   : > { %v897_v21 = vpop.f32.mrb[28].mxu0 }
 0x120   : > { %v533_v22 = vadd.f32 %v897_v21, %v1092_v35  ;;  %v929_v23 = vpop.f32.mrb[28].mxu1  ;;  %v524_v24 = vpop.f32.mrb[29].mxu0 }
 0x121   : > { %v661_v25 = vadd.f32 %v929_v23, %v1092_v35  ;;  %v525_v26 = vadd.f32 %v1092_v35, %v524_v24  ;;  %v652_v27 = vpop.f32.mrb[29].mxu1  ;;  %v898_v28 = vpop.f32.mrb[30].mxu0 }
 0x122   : > { %698 = vst.msk [vmem:[%s1099_s27 + $0xf0] sm:$0xff] %vm667_vm1, %v533_v22  ;;  %v653_v29 = vadd.f32 %v1092_v35, %v652_v27  ;;  %v536_v30 = vadd.f32 %v898_v28, %v1092_v35  ;;  %v930_v31 = vpop.f32.mrb[30].mxu1  ;;  %v527_v32 = vpop.f32.mrb[31].mxu0 }
 0x123   : > { %730 = vst.msk [vmem:[%s1099_s27 + $0x1f0] sm:$0xff] %vm667_vm1, %v661_v25  ;;  %696 = vst.msk [vmem:[%s1099_s27 + $0xe0] sm:$0xff] %vm667_vm1, %v525_v26  ;;  %v664_v33 = vadd.f32 %v930_v31, %v1092_v35  ;;  %v528_v34 = vadd.f32 %v1092_v35, %v527_v32  ;;  %v655_v36 = vpop.f32.mrb[31].mxu1 }
 0x124   : > { %728 = vst.msk [vmem:[%s1099_s27 + $0x1e0] sm:$0xff] %vm667_vm1, %v653_v29  ;;  %699 = vst.msk [vmem:[%s1099_s27 + $0xf8] sm:$0xff] %vm667_vm1, %v536_v30  ;;  %v656_v37 = vadd.f32 %v1092_v35, %v655_v36 }
 0x125   : > { %731 = vst.msk [vmem:[%s1099_s27 + $0x1f8] sm:$0xff] %vm667_vm1, %v664_v33  ;;  %697 = vst.msk [vmem:[%s1099_s27 + $0xe8] sm:$0xff] %vm667_vm1, %v528_v34 }
 0x126   : > { %729 = vst.msk [vmem:[%s1099_s27 + $0x1e8] sm:$0xff] %vm667_vm1, %v656_v37 }
 0x127 PF: > { %s13_s12 = sadd.s32 1, %s947_s12  }
 0x128   : > { %p10_p4 = scmp.ge.s32.totalorder %s13_s12, 4  }
 0x12a   :  { %12 = sbr.rel (!%p10_p4) target bundleno = 1 (0x1), region = 62 }

</bundles_post_ra>
